<compile_context>
chip_gen: v5e
topology: v5e:2x2
jax: 0.10.0
libtpu: 0.0.40
codegen_flags: <defaults>
</compile_context>

<pallas_src>
import functools
import math

import jax
import jax.numpy as jnp
import numpy as np
from jax.experimental import pallas as pl
from jax.experimental.pallas import tpu as pltpu

MAX_SPIKES_PER_RUN = 3.0
EPS = 1e-8


# ---------------------------------------------------------------------------
# Conv2d (dilated / strided / "ceil same" padded) as im2col + tiled matmul
# with a lane-dense (C_out, B*Hc*Wc) output orientation.
# ---------------------------------------------------------------------------
def _conv_matmul_kernel(w_ref, p_ref, o_ref):
    # (Cout, K) @ (K, TN) -> (Cout, TN); output lane dim TN is a 128-multiple.
    o_ref[...] = jnp.dot(w_ref[...], p_ref[...],
                         preferred_element_type=jnp.float32)


def _conv_matmul(w_mat, patches_t, *, tn=256):
    cout, k = w_mat.shape
    k2, n = patches_t.shape
    assert k == k2
    n_pad = (-n) % tn
    if n_pad:
        patches_t = jnp.pad(patches_t, ((0, 0), (0, n_pad)))
    n_total = n + n_pad
    # Actual VMEM use: resident A + double-buffered B tile + output tile.
    vmem_bytes = 4 * (cout * k + 2 * k * tn + 2 * cout * tn)
    out = pl.pallas_call(
        _conv_matmul_kernel,
        out_shape=jax.ShapeDtypeStruct((cout, n_total), jnp.float32),
        grid_spec=pltpu.PrefetchScalarGridSpec(
            num_scalar_prefetch=0,
            grid=(n_total // tn,),
            in_specs=[pl.BlockSpec((cout, k), lambda j: (0, 0)),   # resident
                      pl.BlockSpec((k, tn), lambda j: (0, j))],
            out_specs=pl.BlockSpec((cout, tn), lambda j: (0, j)),
        ),
        compiler_params=pltpu.CompilerParams(
            dimension_semantics=("parallel",),
            vmem_limit_bytes=min(48 << 20, max(8 << 20, 4 * vmem_bytes))),
    )(w_mat, patches_t)
    return out[:, :n]


def _im2col_t(x, kernel_size, dilation, stride, padding):
    """Returns patches of shape (Cin*kh*kw, B*Hc*Wc)."""
    B, Cin, H, W = x.shape
    kh, kw = kernel_size
    dh, dw = dilation
    sh, sw = stride
    ph, pw = padding
    xp = jnp.pad(x, ((0, 0), (0, 0), (ph, ph), (pw, pw)))
    Hp, Wp = H + 2 * ph, W + 2 * pw
    Hc = (Hp - dh * (kh - 1) - 1) // sh + 1
    Wc = (Wp - dw * (kw - 1) - 1) // sw + 1
    cols = []
    for i in range(kh):
        for j in range(kw):
            sl = xp[:, :,
                    i * dh: i * dh + sh * (Hc - 1) + 1: sh,
                    j * dw: j * dw + sw * (Wc - 1) + 1: sw]   # (B, Cin, Hc, Wc)
            cols.append(sl)
    patches = jnp.stack(cols, axis=2)                          # (B,Cin,kh*kw,Hc,Wc)
    patches = patches.reshape(B, Cin * kh * kw, Hc * Wc)
    patches = patches.transpose(1, 0, 2).reshape(Cin * kh * kw, B * Hc * Wc)
    return patches, Hc, Wc


# ---------------------------------------------------------------------------
# Spiking LIF time step (one grid iteration == one timestep).
# ---------------------------------------------------------------------------
def _snn_step_kernel(drive_ref, dT_ref, thr_ref, beta_ref,
                     spk_rec_ref, mem_rec_ref, loss_sq_ref, loss_spread_ref,
                     mem_scr, spk_scr, prev_scr, sq_scr, stepsum_scr,
                     *, inv_sq_count, inv_spread_count):
    t = pl.program_id(0)
    n_steps = pl.num_programs(0)
    beta = beta_ref[0]

    @pl.when(t == 0)
    def _():
        mem_scr[...] = jnp.zeros_like(mem_scr)
        spk_scr[...] = jnp.zeros_like(spk_scr)
        prev_scr[...] = jnp.zeros_like(prev_scr)
        sq_scr[...] = jnp.zeros_like(sq_scr)

    mem = mem_scr[...]
    spk = spk_scr[...]
    prev = prev_scr[...]

    # Lateral reset: rst[e, b*HW+p] = sum_c spk[c, b*HW+p] * d[c, e]
    # One (C,C)@(C,B*HW) MXU matmul per step (batch merged into lanes).
    rst = jnp.dot(dT_ref[...], spk, preferred_element_type=jnp.float32)

    # Leaky neuron, soft reset.  drive == conv_x * (1 - beta)  (the (1-beta)
    # scaling is folded into the conv weights in the wrapper).
    mem = (mem - rst) * beta + drive_ref[...]

    # Folded threshold:  mem/(norm+eps) - b > 0  <=>  mem > b*(norm+eps)
    # (valid because norm + eps > 0 always).
    # TODO(synk): surrogate_sigma only shapes the surrogate *gradient*; the
    # custom backward (VJP) of spike_fn is not implemented here (forward only).
    heavi = (mem > thr_ref[...]).astype(jnp.float32)

    # spike_limit=True: limit total spikes per run.
    new_spk = (MAX_SPIKES_PER_RUN - prev) * heavi

    mem_scr[...] = mem
    spk_scr[...] = new_spk
    prev_scr[...] = prev + new_spk

    spk_rec_ref[0] = new_spk
    mem_rec_ref[0] = mem

    # Deferred loss accumulation (no full cross-lane reduce per step).
    sq_scr[...] = sq_scr[...] + new_spk * new_spk
    stepsum_scr[pl.ds(t, 1), :] = jnp.sum(new_spk, axis=0, keepdims=True)

    @pl.when(t == n_steps - 1)
    def _():
        # Regularization_Term = ['squared', 'max']
        loss_sq_ref[0] = jnp.sum(sq_scr[...]) * inv_sq_count
        per_step = jnp.sum(stepsum_scr[...], axis=1, keepdims=True)   # (T, 1)
        loss_spread_ref[0] = jnp.max(per_step) * inv_spread_count


# ---------------------------------------------------------------------------
# Forward wrapper (parameter-derived terms, layout plumbing)
# ---------------------------------------------------------------------------
def spiking_conv2d_forward(x, w, beta, b_param, *, kernel_size, dilation,
                           stride, output_shape, nb_steps, eps=EPS):
    B, Cin, H, W = x.shape
    Cout = w.shape[0]
    kh, kw = kernel_size
    out_h, out_w = output_shape
    HW = out_h * out_w
    BHW = B * HW
    T = nb_steps

    # conv2d with PyTorch ceil((k-1)*d/2) padding, via lane-dense im2col matmul.
    padding = (int(math.ceil((kh - 1) * dilation[0] / 2)),
               int(math.ceil((kw - 1) * dilation[1] / 2)))
    patches_t, Hc, Wc = _im2col_t(x, kernel_size, dilation, stride, padding)
    assert Hc >= out_h and Wc >= out_w, "conv output smaller than output_shape"

    w_f32 = w.astype(jnp.float32)
    # Fold the per-timestep `input * (1 - beta)` scaling into the tiny conv
    # weight matrix (one (Cout, K) scale instead of T full-tensor multiplies).
    w_mat = w_f32.reshape(Cout, Cin * kh * kw) * (1.0 - beta[0])

    drive = _conv_matmul(w_mat, patches_t.astype(jnp.float32))   # (Cout, B*Hc*Wc)
    drive = drive.reshape(Cout, B, Hc, Wc)[:, :, :out_h, :out_w]  # crop
    drive = drive.reshape(Cout, BHW)

    # Weight-derived terms, computed once outside the time loop.
    d = jnp.einsum('ocij,pcij->op', w_f32, w_f32)                # (Cout, Cout)
    d_t = d.T                                                    # rst = d^T @ spk
    norm = jnp.sum(w_f32 * w_f32, axis=(1, 2, 3))                # (Cout,)
    thresh = b_param.astype(jnp.float32) * (norm + eps)          # (Cout,)
    thr = jnp.broadcast_to(thresh[:, None], (Cout, BHW))         # hoisted broadcast
    beta_s = beta.reshape(1).astype(jnp.float32)

    # Explicit VMEM budget: resident inputs + double-buffered output slabs
    # + state / accumulator scratch (stays constant in T).
    slab = 4 * Cout * BHW
    snn_vmem = (2 * slab + 4 * Cout * Cout      # drive + thr + d^T (resident)
                + 2 * 2 * slab                  # spk_rec/mem_rec, double-buffered
                + 4 * slab                      # mem/spk/prev/sq scratch
                + 4 * T * BHW)                  # per-step spike-sum scratch
    vmem_limit = min(48 << 20, max(8 << 20, 2 * snn_vmem))

    kernel = functools.partial(
        _snn_step_kernel,
        inv_sq_count=0.5 / float(T * B * Cout * HW),
        inv_spread_count=1.0 / float(B * Cout * HW))

    # TODO(synk): for large B on v7x, add a leading "parallel" batch grid axis
    # (per-core state scratch + cross-core loss reduction) to use both TCs.
    snn = pl.pallas_call(
        kernel,
        out_shape=(
            jax.ShapeDtypeStruct((T, Cout, BHW), jnp.float32),   # spk_rec
            jax.ShapeDtypeStruct((T, Cout, BHW), jnp.float32),   # mem_rec
            jax.ShapeDtypeStruct((1,), jnp.float32),             # 0.5*mean(spk^2)
            jax.ShapeDtypeStruct((1,), jnp.float32),             # spread loss (max)
        ),
        grid_spec=pltpu.PrefetchScalarGridSpec(
            num_scalar_prefetch=0,
            grid=(T,),
            in_specs=[
                pl.BlockSpec((Cout, BHW), lambda t: (0, 0)),     # drive (resident)
                pl.BlockSpec((Cout, Cout), lambda t: (0, 0)),    # d^T   (resident)
                pl.BlockSpec((Cout, BHW), lambda t: (0, 0)),     # thresh (resident)
                pl.BlockSpec(memory_space=pltpu.MemorySpace.SMEM),   # beta scalar
            ],
            out_specs=(
                pl.BlockSpec((1, Cout, BHW), lambda t: (t, 0, 0)),
                pl.BlockSpec((1, Cout, BHW), lambda t: (t, 0, 0)),
                pl.BlockSpec(memory_space=pltpu.MemorySpace.SMEM),
                pl.BlockSpec(memory_space=pltpu.MemorySpace.SMEM),
            ),
            scratch_shapes=[
                pltpu.VMEM((Cout, BHW), jnp.float32),   # mem state
                pltpu.VMEM((Cout, BHW), jnp.float32),   # spk state
                pltpu.VMEM((Cout, BHW), jnp.float32),   # previous spikes
                pltpu.VMEM((Cout, BHW), jnp.float32),   # sum(spk^2) accumulator
                pltpu.VMEM((T, BHW), jnp.float32),      # per-step spike sums
            ],
        ),
        compiler_params=pltpu.CompilerParams(
            dimension_semantics=("arbitrary",),
            vmem_limit_bytes=vmem_limit),
    )
    spk_rec_t, mem_rec_t, loss_sq, loss_spread = snn(drive, d_t, thr, beta_s)

    # Back to PyTorch convention (B, C_out, T, H, W).
    spk_rec = spk_rec_t.reshape(T, Cout, B, out_h, out_w).transpose(2, 1, 0, 3, 4)
    mem_rec = mem_rec_t.reshape(T, Cout, B, out_h, out_w).transpose(2, 1, 0, 3, 4)

    # flatten_output=False -> output is spk_rec; loss is [squared, max-spread].
    return spk_rec, (loss_sq[0], loss_spread[0]), mem_rec


if __name__ == "__main__":
    B, Cin, H, W = 2, 4, 16, 16
    Cout = 8
    kernel_size = (3, 3)
    dilation = (1, 1)
    stride = (1, 1)
    output_shape = (16, 16)
    nb_steps = 8
    w_init_mean, w_init_std = 0.0, 1.0

    key = jax.random.PRNGKey(0)
    kx, kw_key = jax.random.split(key)
    x = jax.random.normal(kx, (B, Cin, H, W), dtype=jnp.float32)
    w_std = w_init_std * np.sqrt(1.0 / (Cin * float(np.prod(kernel_size))))
    w = (w_init_mean + w_std *
         jax.random.normal(kw_key, (Cout, Cin) + kernel_size, dtype=jnp.float32))
    # beta_init_method='constant' (clamped to [0,1]); b_init_method='constant'
    # (clamped to >= 0).
    beta = jnp.full((1,), 0.7, dtype=jnp.float32)
    b_param = jnp.full((Cout,), 0.5, dtype=jnp.float32)

    fwd = jax.jit(functools.partial(
        spiking_conv2d_forward,
        kernel_size=kernel_size, dilation=dilation, stride=stride,
        output_shape=output_shape, nb_steps=nb_steps))
    output, (loss_sq, loss_spread), mem_rec = fwd(x, w, beta, b_param)
    jax.block_until_ready(output)

    out_np = np.asarray(output)
    assert output.shape == (B, Cout, nb_steps) + output_shape
    assert mem_rec.shape == (B, Cout, nb_steps) + output_shape
    assert np.isfinite(float(loss_sq)) and np.isfinite(float(loss_spread))
    assert np.all(np.isfinite(out_np))
    assert np.all(np.isfinite(np.asarray(mem_rec)))
    # spike_limit semantics: spikes are non-negative and the per-neuron total
    # over the run never exceeds Max_spikes_per_run.
    assert np.all(out_np >= -1e-6)
    assert np.all(out_np.sum(axis=2) <= MAX_SPIKES_PER_RUN + 1e-3)
    assert float(loss_sq) >= 0.0 and float(loss_spread) >= 0.0
    print("KERNEL_OK")
</pallas_src>

<mosaic_0001>
module attributes {stable_mosaic.version = 11 : i64} {
  func.func @_conv_matmul_kernel(%arg0: i32, %arg1: memref<8x36xf32, #tpu.memory_space<vmem>>, %arg2: memref<36x256xf32, #tpu.memory_space<vmem>>, %arg3: memref<8x256xf32, #tpu.memory_space<vmem>>) attributes {dimension_semantics = [#tpu.dimension_semantics<parallel>], iteration_bounds = array<i64: 2>, scalar_prefetch = 0 : i64, scratch_operands = 0 : i64, tpu.core_type = #tpu.core_type<tc>, window_params = [{pipeline_mode = #tpu.pipeline_mode<synchronous>, transform_indices = @transform_0, window_bounds = array<i64: 8, 36>}, {transform_indices = @transform_1, window_bounds = array<i64: 36, 256>}, {transform_indices = @transform_2, window_bounds = array<i64: 8, 256>}]} {
    %c0 = arith.constant 0 : index
    %c0_0 = arith.constant 0 : index
    %0 = vector.load %arg1[%c0, %c0_0] : memref<8x36xf32, #tpu.memory_space<vmem>>, vector<8x36xf32>
    %c0_1 = arith.constant 0 : index
    %c0_2 = arith.constant 0 : index
    %1 = vector.load %arg2[%c0_1, %c0_2] : memref<36x256xf32, #tpu.memory_space<vmem>>, vector<36x256xf32>
    %cst = arith.constant dense<0.000000e+00> : vector<8x256xf32>
    %2 = tpu.matmul %0, %1, %cst {dimension_numbers = #tpu.dot_dimension_numbers<[1], [0], [0], [1], [0, 0, 1, 1], [], []>} : vector<8x36xf32>, vector<36x256xf32>, vector<8x256xf32> -> vector<8x256xf32>
    %c0_3 = arith.constant 0 : index
    %c0_4 = arith.constant 0 : index
    %3 = vector.load %arg3[%c0_3, %c0_4] : memref<8x256xf32, #tpu.memory_space<vmem>>, vector<8x256xf32>
    tpu.vector_store %arg3[%c0_3, %c0_4], %2 {strides = array<i32>} : memref<8x256xf32, #tpu.memory_space<vmem>>, vector<8x256xf32>,
    return
  }
  func.func @transform_0(%arg0: i32) -> (i32, i32) {
    %c0_i32 = arith.constant 0 : i32
    %c0_i32_0 = arith.constant 0 : i32
    %c0_i32_1 = arith.constant 0 : i32
    return %c0_i32, %c0_i32_0 : i32, i32
  }
  func.func @transform_1(%arg0: i32) -> (i32, i32) {
    %c0_i32 = arith.constant 0 : i32
    %c0_i32_0 = arith.constant 0 : i32
    return %c0_i32, %arg0 : i32, i32
  }
  func.func @transform_2(%arg0: i32) -> (i32, i32) {
    %c0_i32 = arith.constant 0 : i32
    %c0_i32_0 = arith.constant 0 : i32
    return %c0_i32, %arg0 : i32, i32
  }
}

module attributes {stable_mosaic.version = 11 : i64} {
  func.func @_snn_step_kernel(%arg0: i32, %arg1: memref<8x512xf32, #tpu.memory_space<vmem>>, %arg2: memref<8x8xf32, #tpu.memory_space<vmem>>, %arg3: memref<8x512xf32, #tpu.memory_space<vmem>>, %arg4: memref<1xf32, #tpu.memory_space<smem>>, %arg5: memref<1x8x512xf32, #tpu.memory_space<vmem>>, %arg6: memref<1x8x512xf32, #tpu.memory_space<vmem>>, %arg7: memref<1xf32, #tpu.memory_space<smem>>, %arg8: memref<1xf32, #tpu.memory_space<smem>>, %arg9: memref<8x512xf32, #tpu.memory_space<vmem>>, %arg10: memref<8x512xf32, #tpu.memory_space<vmem>>, %arg11: memref<8x512xf32, #tpu.memory_space<vmem>>, %arg12: memref<8x512xf32, #tpu.memory_space<vmem>>, %arg13: memref<8x512xf32, #tpu.memory_space<vmem>>) attributes {dimension_semantics = [#tpu.dimension_semantics<arbitrary>], iteration_bounds = array<i64: 8>, scalar_prefetch = 0 : i64, scratch_operands = 5 : i64, tpu.core_type = #tpu.core_type<tc>, window_params = [{pipeline_mode = #tpu.pipeline_mode<synchronous>, transform_indices = @transform_0, window_bounds = array<i64: 8, 512>}, {pipeline_mode = #tpu.pipeline_mode<synchronous>, transform_indices = @transform_1, window_bounds = array<i64: 8, 8>}, {pipeline_mode = #tpu.pipeline_mode<synchronous>, transform_indices = @transform_2, window_bounds = array<i64: 8, 512>}, {transform_indices = @transform_3, window_bounds = array<i64: 1>}, {transform_indices = @transform_4, window_bounds = array<i64: 1, 8, 512>}, {transform_indices = @transform_5, window_bounds = array<i64: 1, 8, 512>}, {transform_indices = @transform_6, window_bounds = array<i64: 1>}, {transform_indices = @transform_7, window_bounds = array<i64: 1>}]} {
    %c0 = arith.constant 0 : index
    %0 = memref.load %arg4[%c0] : memref<1xf32, #tpu.memory_space<smem>>
    %c0_i32 = arith.constant 0 : i32
    %1 = arith.cmpi eq, %arg0, %c0_i32 : i32
    %2 = arith.extui %1 : i1 to i32
    %c0_i32_0 = arith.constant 0 : i32
    %3 = arith.cmpi ne, %2, %c0_i32_0 : i32
    scf.if %3 {
      %cst_33 = arith.constant 0.000000e+00 : f32
      %42 = vector.broadcast %cst_33 : f32 to vector<8x512xf32>
      %c0_34 = arith.constant 0 : index
      %c0_35 = arith.constant 0 : index
      %43 = vector.load %arg9[%c0_34, %c0_35] : memref<8x512xf32, #tpu.memory_space<vmem>>, vector<8x512xf32>
      tpu.vector_store %arg9[%c0_34, %c0_35], %42 {strides = array<i32>} : memref<8x512xf32, #tpu.memory_space<vmem>>, vector<8x512xf32>,
      %cst_36 = arith.constant 0.000000e+00 : f32
      %44 = vector.broadcast %cst_36 : f32 to vector<8x512xf32>
      %c0_37 = arith.constant 0 : index
      %c0_38 = arith.constant 0 : index
      %45 = vector.load %arg10[%c0_37, %c0_38] : memref<8x512xf32, #tpu.memory_space<vmem>>, vector<8x512xf32>
      tpu.vector_store %arg10[%c0_37, %c0_38], %44 {strides = array<i32>} : memref<8x512xf32, #tpu.memory_space<vmem>>, vector<8x512xf32>,
      %cst_39 = arith.constant 0.000000e+00 : f32
      %46 = vector.broadcast %cst_39 : f32 to vector<8x512xf32>
      %c0_40 = arith.constant 0 : index
      %c0_41 = arith.constant 0 : index
      %47 = vector.load %arg11[%c0_40, %c0_41] : memref<8x512xf32, #tpu.memory_space<vmem>>, vector<8x512xf32>
      tpu.vector_store %arg11[%c0_40, %c0_41], %46 {strides = array<i32>} : memref<8x512xf32, #tpu.memory_space<vmem>>, vector<8x512xf32>,
      %cst_42 = arith.constant 0.000000e+00 : f32
      %48 = vector.broadcast %cst_42 : f32 to vector<8x512xf32>
      %c0_43 = arith.constant 0 : index
      %c0_44 = arith.constant 0 : index
      %49 = vector.load %arg12[%c0_43, %c0_44] : memref<8x512xf32, #tpu.memory_space<vmem>>, vector<8x512xf32>
      tpu.vector_store %arg12[%c0_43, %c0_44], %48 {strides = array<i32>} : memref<8x512xf32, #tpu.memory_space<vmem>>, vector<8x512xf32>,
    } else {
    }
    %c0_1 = arith.constant 0 : index
    %c0_2 = arith.constant 0 : index
    %4 = vector.load %arg9[%c0_1, %c0_2] : memref<8x512xf32, #tpu.memory_space<vmem>>, vector<8x512xf32>
    %c0_3 = arith.constant 0 : index
    %c0_4 = arith.constant 0 : index
    %5 = vector.load %arg10[%c0_3, %c0_4] : memref<8x512xf32, #tpu.memory_space<vmem>>, vector<8x512xf32>
    %c0_5 = arith.constant 0 : index
    %c0_6 = arith.constant 0 : index
    %6 = vector.load %arg11[%c0_5, %c0_6] : memref<8x512xf32, #tpu.memory_space<vmem>>, vector<8x512xf32>
    %c0_7 = arith.constant 0 : index
    %c0_8 = arith.constant 0 : index
    %7 = vector.load %arg2[%c0_7, %c0_8] : memref<8x8xf32, #tpu.memory_space<vmem>>, vector<8x8xf32>
    %cst = arith.constant dense<0.000000e+00> : vector<8x512xf32>
    %8 = tpu.matmul %7, %5, %cst {dimension_numbers = #tpu.dot_dimension_numbers<[1], [0], [0], [1], [0, 0, 1, 1], [], []>} : vector<8x8xf32>, vector<8x512xf32>, vector<8x512xf32> -> vector<8x512xf32>
    %9 = arith.subf %4, %8 : vector<8x512xf32>
    %10 = vector.broadcast %0 : f32 to vector<8x512xf32>
    %11 = arith.mulf %9, %10 : vector<8x512xf32>
    %c0_9 = arith.constant 0 : index
    %c0_10 = arith.constant 0 : index
    %12 = vector.load %arg1[%c0_9, %c0_10] : memref<8x512xf32, #tpu.memory_space<vmem>>, vector<8x512xf32>
    %13 = arith.addf %11, %12 : vector<8x512xf32>
    %c0_11 = arith.constant 0 : index
    %c0_12 = arith.constant 0 : index
    %14 = vector.load %arg3[%c0_11, %c0_12] : memref<8x512xf32, #tpu.memory_space<vmem>>, vector<8x512xf32>
    %15 = arith.cmpf ogt, %13, %14 : vector<8x512xf32>
    %16 = arith.extui %15 : vector<8x512xi1> to vector<8x512xi32>
    %17 = arith.sitofp %16 : vector<8x512xi32> to vector<8x512xf32>
    %cst_13 = arith.constant 3.000000e+00 : f32
    %18 = vector.broadcast %cst_13 : f32 to vector<8x512xf32>
    %19 = arith.subf %18, %6 : vector<8x512xf32>
    %20 = arith.mulf %19, %17 : vector<8x512xf32>
    %c0_14 = arith.constant 0 : index
    %c0_15 = arith.constant 0 : index
    %21 = vector.load %arg9[%c0_14, %c0_15] : memref<8x512xf32, #tpu.memory_space<vmem>>, vector<8x512xf32>
    tpu.vector_store %arg9[%c0_14, %c0_15], %13 {strides = array<i32>} : memref<8x512xf32, #tpu.memory_space<vmem>>, vector<8x512xf32>,
    %c0_16 = arith.constant 0 : index
    %c0_17 = arith.constant 0 : index
    %22 = vector.load %arg10[%c0_16, %c0_17] : memref<8x512xf32, #tpu.memory_space<vmem>>, vector<8x512xf32>
    tpu.vector_store %arg10[%c0_16, %c0_17], %20 {strides = array<i32>} : memref<8x512xf32, #tpu.memory_space<vmem>>, vector<8x512xf32>,
    %23 = arith.addf %6, %20 : vector<8x512xf32>
    %c0_18 = arith.constant 0 : index
    %c0_19 = arith.constant 0 : index
    %24 = vector.load %arg11[%c0_18, %c0_19] : memref<8x512xf32, #tpu.memory_space<vmem>>, vector<8x512xf32>
    tpu.vector_store %arg11[%c0_18, %c0_19], %23 {strides = array<i32>} : memref<8x512xf32, #tpu.memory_space<vmem>>, vector<8x512xf32>,
    %c0_20 = arith.constant 0 : index
    %c0_21 = arith.constant 0 : index
    %c0_22 = arith.constant 0 : index
    %25 = vector.load %arg5[%c0_20, %c0_21, %c0_22] : memref<1x8x512xf32, #tpu.memory_space<vmem>>, vector<1x8x512xf32>
    %26 = vector.shape_cast %25 : vector<1x8x512xf32> to vector<8x512xf32>
    %27 = vector.shape_cast %20 : vector<8x512xf32> to vector<1x8x512xf32>
    tpu.vector_store %arg5[%c0_20, %c0_21, %c0_22], %27 {strides = array<i32>} : memref<1x8x512xf32, #tpu.memory_space<vmem>>, vector<1x8x512xf32>,
    %c0_23 = arith.constant 0 : index
    %c0_24 = arith.constant 0 : index
    %c0_25 = arith.constant 0 : index
    %28 = vector.load %arg6[%c0_23, %c0_24, %c0_25] : memref<1x8x512xf32, #tpu.memory_space<vmem>>, vector<1x8x512xf32>
    %29 = vector.shape_cast %28 : vector<1x8x512xf32> to vector<8x512xf32>
    %30 = vector.shape_cast %13 : vector<8x512xf32> to vector<1x8x512xf32>
    tpu.vector_store %arg6[%c0_23, %c0_24, %c0_25], %30 {strides = array<i32>} : memref<1x8x512xf32, #tpu.memory_space<vmem>>, vector<1x8x512xf32>,
    %c0_26 = arith.constant 0 : index
    %c0_27 = arith.constant 0 : index
    %31 = vector.load %arg12[%c0_26, %c0_27] : memref<8x512xf32, #tpu.memory_space<vmem>>, vector<8x512xf32>
    %32 = arith.mulf %20, %20 : vector<8x512xf32>
    %33 = arith.addf %31, %32 : vector<8x512xf32>
    %c0_28 = arith.constant 0 : index
    %c0_29 = arith.constant 0 : index
    %34 = vector.load %arg12[%c0_28, %c0_29] : memref<8x512xf32, #tpu.memory_space<vmem>>, vector<8x512xf32>
    tpu.vector_store %arg12[%c0_28, %c0_29], %33 {strides = array<i32>} : memref<8x512xf32, #tpu.memory_space<vmem>>, vector<8x512xf32>,
    %cst_30 = arith.constant dense<0.000000e+00> : vector<512xf32>
    %35 = vector.multi_reduction <add>, %20, %cst_30 [0] : vector<8x512xf32> to vector<512xf32>
    %36 = vector.shape_cast %35 : vector<512xf32> to vector<1x512xf32>
    %37 = arith.index_cast %arg0 : i32 to index
    %c0_31 = arith.constant 0 : index
    %38 = vector.load %arg13[%37, %c0_31] : memref<8x512xf32, #tpu.memory_space<vmem>>, vector<1x512xf32>
    tpu.vector_store %arg13[%37, %c0_31], %36 {strides = array<i32>} : memref<8x512xf32, #tpu.memory_space<vmem>>, vector<1x512xf32>,
    %c7_i32 = arith.constant 7 : i32
    %39 = arith.cmpi eq, %arg0, %c7_i32 : i32
    %40 = arith.extui %39 : i1 to i32
    %c0_i32_32 = arith.constant 0 : i32
    %41 = arith.cmpi ne, %40, %c0_i32_32 : i32
    scf.if %41 {
      %c0_33 = arith.constant 0 : index
      %c0_34 = arith.constant 0 : index
      %42 = vector.load %arg12[%c0_33, %c0_34] : memref<8x512xf32, #tpu.memory_space<vmem>>, vector<8x512xf32>
      %43 = vector.shape_cast %42 : vector<8x512xf32> to vector<1x8x512xf32>
      %cst_35 = arith.constant dense<0.000000e+00> : vector<1xf32>
      %44 = vector.multi_reduction <add>, %43, %cst_35 [1, 2] : vector<1x8x512xf32> to vector<1xf32>
      %45 = vector.shape_cast %44 : vector<1xf32> to vector<1x1x1xf32>
      %46 = vector.extract %45[0, 0, 0] : f32 from vector<1x1x1xf32>
      %cst_36 = arith.constant 1.52587891E-5 : f32
      %47 = arith.mulf %46, %cst_36 : f32
      %c0_37 = arith.constant 0 : index
      %48 = memref.load %arg7[%c0_37] : memref<1xf32, #tpu.memory_space<smem>>
      memref.store %47, %arg7[%c0_37] : memref<1xf32, #tpu.memory_space<smem>>
      %c0_38 = arith.constant 0 : index
      %c0_39 = arith.constant 0 : index
      %49 = vector.load %arg13[%c0_38, %c0_39] : memref<8x512xf32, #tpu.memory_space<vmem>>, vector<8x512xf32>
      %cst_40 = arith.constant dense<0.000000e+00> : vector<8xf32>
      %50 = vector.multi_reduction <add>, %49, %cst_40 [1] : vector<8x512xf32> to vector<8xf32>
      %51 = vector.shape_cast %50 : vector<8xf32> to vector<8x1xf32>
      %52 = vector.shape_cast %51 : vector<8x1xf32> to vector<1x8x1xf32>
      %cst_41 = arith.constant dense<0xFF800000> : vector<1xf32>
      %53 = vector.multi_reduction <maximumf>, %52, %cst_41 [1, 2] : vector<1x8x1xf32> to vector<1xf32>
      %54 = vector.shape_cast %53 : vector<1xf32> to vector<1x1x1xf32>
      %55 = vector.extract %54[0, 0, 0] : f32 from vector<1x1x1xf32>
      %cst_42 = arith.constant 2.44140625E-4 : f32
      %56 = arith.mulf %55, %cst_42 : f32
      %c0_43 = arith.constant 0 : index
      %57 = memref.load %arg8[%c0_43] : memref<1xf32, #tpu.memory_space<smem>>
      memref.store %56, %arg8[%c0_43] : memref<1xf32, #tpu.memory_space<smem>>
    } else {
    }
    return
  }
  func.func @transform_0(%arg0: i32) -> (i32, i32) {
    %c0_i32 = arith.constant 0 : i32
    %c0_i32_0 = arith.constant 0 : i32
    %c0_i32_1 = arith.constant 0 : i32
    return %c0_i32, %c0_i32_0 : i32, i32
  }
  func.func @transform_1(%arg0: i32) -> (i32, i32) {
    %c0_i32 = arith.constant 0 : i32
    %c0_i32_0 = arith.constant 0 : i32
    %c0_i32_1 = arith.constant 0 : i32
    return %c0_i32, %c0_i32_0 : i32, i32
  }
  func.func @transform_2(%arg0: i32) -> (i32, i32) {
    %c0_i32 = arith.constant 0 : i32
    %c0_i32_0 = arith.constant 0 : i32
    %c0_i32_1 = arith.constant 0 : i32
    return %c0_i32, %c0_i32_0 : i32, i32
  }
  func.func @transform_3(%arg0: i32) -> i32 {
    %c0_i32 = arith.constant 0 : i32
    %c0_i32_0 = arith.constant 0 : i32
    return %c0_i32 : i32
  }
  func.func @transform_4(%arg0: i32) -> (i32, i32, i32) {
    %c0_i32 = arith.constant 0 : i32
    %c0_i32_0 = arith.constant 0 : i32
    %c0_i32_1 = arith.constant 0 : i32
    return %arg0, %c0_i32, %c0_i32_0 : i32, i32, i32
  }
  func.func @transform_5(%arg0: i32) -> (i32, i32, i32) {
    %c0_i32 = arith.constant 0 : i32
    %c0_i32_0 = arith.constant 0 : i32
    %c0_i32_1 = arith.constant 0 : i32
    return %arg0, %c0_i32, %c0_i32_0 : i32, i32, i32
  }
  func.func @transform_6(%arg0: i32) -> i32 {
    %c0_i32 = arith.constant 0 : i32
    %c0_i32_0 = arith.constant 0 : i32
    return %c0_i32 : i32
  }
  func.func @transform_7(%arg0: i32) -> i32 {
    %c0_i32 = arith.constant 0 : i32
    %c0_i32_0 = arith.constant 0 : i32
    return %c0_i32 : i32
  }
}

</mosaic_0001>

<bundles_post_ra>
// kernel: spiking_conv2d_forward.2
= control target key start
LH: loop header
LB: loop body
LE: loop exit
PB: predicated region body
PF: predicated region fallthrough
CT: control target
= control target key end

     0   :  { %s391_s9 = smov 0   ;;  %s393_s10 = smov 0   ;;  %s446_s0 = inlined_call_operand.vmem [shape: f32[8,36], index: 0, kind: input, shape index: {}]   ;;  %s447_s1 = inlined_call_operand.vmem [shape: f32[36,512], index: 1, kind: input, shape index: {}]   ;;  %s448_s2 = inlined_call_operand.vmem [shape: f32[8,512], index: 2, kind: output, shape index: {}]  }
   0x1   :  { %s395_s11 = smov 0  }
   0x2 LB: > { %s310_s12 = sadd.s32 4294967295, %s374_s11   ;;  %s408_s13 = sadd.s32 1, %s374_s11   ;;  %s374_s11 = sphi %s395_s11, %s451_s11   ;;  %s370_s10 = sphi %s393_s10, %s450_s10   ;;  %s366_s9 = sphi %s391_s9, %s449_s9  }
   0x3   : > { %s37_s14 = ssub.s32 %s374_s11, %s408_s13  ;;  %s40_s15 = sadd.s32 1, %s370_s10 }
   0x4   : > { %p38_p0 = scmp.eq.s32.totalorder %s37_s14, 0  ;;  %p47_p1 = scmp.ne.s32.totalorder %s370_s10, %s366_s9 }
   0x5   : > { %p48_p2 = scmp.eq.s32.totalorder %s374_s11, 0  ;;  %p313_p4 = scmp.ge.s32.totalorder %s374_s11, 2 }
   0x6   : > { %s417_s16 = scalar_select %p38_p0, %s370_s10, %s40_s15  }
   0x7   : > { %p49_p3 = por %p48_p2, %p47_p1  ;;  %102 = sbr.rel (%p313_p4) target bundleno = 26 (0x1a), region = 20 }
   0xc   : > { %105 = sbr.rel (!%p49_p3) target bundleno = 26 (0x1a), region = 24  ;;  %s107_s17 = sand.u32 (%p49_p3), 1, %s370_s10  }
   0xd   : > { %s325_s18 = sshll.u32 (%p49_p3), %s374_s11, 4  ;;  %s326_s19 = smul.u32 (%p49_p3), 80, %s107_s17 }
   0xe   : > { %s112_s22 = scalar_lea.vmem (%p49_p3), %s447_s1, %s325_s18 }
   0xf   : > { %v125_v0 = vld [vmem:[%s112_s22] sm:$0xff] (%p49_p3)  ;;  %v127_v1 = vld [vmem:[%s112_s22 + $0x8] sm:$0xff] (%p49_p3)  ;;  %s109_s23 = scalar_lea.vmem (%p49_p3), [#allocation2], %s326_s19 }
  0x10   : > { %v129_v2 = vld [vmem:[%s112_s22 + $0x20] sm:$0xff] (%p49_p3)  ;;  %126 = vst [vmem:[%s109_s23] sm:$0xff] (%p49_p3), %v125_v0  ;;  %v131_v3 = vld [vmem:[%s112_s22 + $0x28] sm:$0xff] (%p49_p3) }
  0x11   : > { %128 = vst [vmem:[%s109_s23 + $0x8] sm:$0xff] %v127_v1  ;;  %v133_v4 = vld [vmem:[%s112_s22 + $0x40] sm:$0xff]  ;;  %v135_v5 = vld [vmem:[%s112_s22 + $0x48] sm:$0xff] }
  0x12   : > { %130 = vst [vmem:[%s109_s23 + $0x10] sm:$0xff] %v129_v2  ;;  %v137_v6 = vld [vmem:[%s112_s22 + $0x60] sm:$0xff]  ;;  %v139_v7 = vld [vmem:[%s112_s22 + $0x68] sm:$0xff] }
  0x13   : > { %132 = vst [vmem:[%s109_s23 + $0x18] sm:$0xff] %v131_v3  ;;  %v141_v8 = vld [vmem:[%s112_s22 + $0x80] sm:$0xff]  ;;  %v143_v9 = vld [vmem:[%s112_s22 + $0x88] sm:$0xff] }
  0x14   : > { %134 = vst [vmem:[%s109_s23 + $0x20] sm:$0xff] %v133_v4 }
  0x15   : > { %136 = vst [vmem:[%s109_s23 + $0x28] sm:$0xff] %v135_v5 }
  0x16   : > { %138 = vst [vmem:[%s109_s23 + $0x30] sm:$0xff] %v137_v6 }
  0x17   : > { %140 = vst [vmem:[%s109_s23 + $0x38] sm:$0xff] %v139_v7 }
  0x18   : > { %142 = vst [vmem:[%s109_s23 + $0x40] sm:$0xff] %v141_v8 }
  0x19   : > { %144 = vst [vmem:[%s109_s23 + $0x48] sm:$0xff] %v143_v9 }
  0x1a PF: > { %p316_p5 = scmp.ge.s32.totalorder %s374_s11, 1  ;;  %p149_p6 = scmp.lt.s32.totalorder %s374_s11, 3 }
  0x1c   : > { %p150_p7 = pnand %p316_p5, %p149_p6 }
  0x1d   : > { %s156_s24 = sand.u32 (!%p150_p7), 1, %s366_s9   ;;  %s317_s29 = sshll.u32 (!%p150_p7), %s310_s12, 1 }
  0x1e   : > { %153 = sbr.rel (%p150_p7) target bundleno = 173 (0xad), region = 47  ;;  %p179_p8 = scmp.lt.s32.totalorder (!%p150_p7), %s317_s29, 3 }
  0x1f   : > { %s327_s25 = smul.u32 (!%p150_p7), 80, %s156_s24 }
  0x21   : > { %s158_s26 = scalar_lea.vmem (!%p150_p7), [#allocation2], %s327_s25 }
  0x23   : > { %vm199_vm0 = vcmask 1043456   ;;  %v193_v10 = vld [vmem:[%s158_s26 + $0x40] sm:$0xf]  ;;  %v194_v11 = vld [vmem:[%s158_s26 + $0x48] sm:$0xf]  ;;  %v191_v12 = vld [vmem:[%s158_s26 + $0x30] sm:$0xff] }
  0x24   : > { %319 = vmatpush.msk.msra.mxu0 %vm199_vm0, %v193_v10  ;;  %321 = vmatpush.msk.msra.mxu1 %vm199_vm0, %v194_v11  ;;  %v192_v13 = vld [vmem:[%s158_s26 + $0x38] sm:$0xff]  ;;  %v189_v14 = vld [vmem:[%s158_s26 + $0x20] sm:$0xff]  ;;  %v190_v15 = vld [vmem:[%s158_s26 + $0x28] sm:$0xff]  ;;  %vm195_vm1 = vcmask 293888   ;;  %s453_s29 = smov (!%p179_p8, %s317_s29), 3 }
  0x25   : > { %v187_v16 = vld [vmem:[%s158_s26 + $0x10] sm:$0xff]  ;;  %v188_v17 = vld [vmem:[%s158_s26 + $0x18] sm:$0xff]  ;;  %v185_v18 = vld [vmem:[%s158_s26] sm:$0xff]  ;;  %s318_s30 = sshll.u32 %s453_s29, 3 }
  0x26   : > { %218 = vmatpush.msra.mxu0 %v191_v12  ;;  %238 = vmatpush.msra.mxu1 %v192_v13  ;;  %v186_v19 = vld [vmem:[%s158_s26 + $0x8] sm:$0xff]  ;;  %v184_v20 = vld [vmem:[%s446_s0] sm:$0xff]  ;;  %s182_s5 = scalar_lea.vmem %s448_s2, %s318_s30 }
  0x28   : > { %219 = vmatpush.msra.mxu0 %v189_v14  ;;  %239 = vmatpush.msra.mxu1 %v190_v15 }
  0x2a   : > { %220 = vmatpush.msra.mxu0 %v187_v16  ;;  %240 = vmatpush.msra.mxu1 %v188_v17 }
  0x2c   : > { %221 = vmatpush.msra.mxu0 %v185_v18  ;;  %241 = vmatpush.msra.mxu1 %v186_v19 }
  0x2d   : > { %320 = vmatmul.msk.f32.vlgmr.msra.gmra.mxu0 %vm195_vm1, %v184_v20  ;;  %322 = vmatmul.msk.f32.vlgmr.msra.gmra.mxu1 %vm195_vm1, %v184_v20 }
  0xaa   : > { %v223_v21 = vpop.f32.mrf.mxu0  ;;  %v243_v22 = vpop.f32.mrf.mxu1 }
  0xab   : > { %246 = vst [vmem:[%s182_s5] sm:$0xff] %v223_v21 }
  0xac   : > { %247 = vst [vmem:[%s182_s5 + $0x8] sm:$0xff] %v243_v22 }
  0xad PF: > { %p9_p9 = scmp.ge.s32.totalorder %s408_s13, 4   ;;  %s449_s9 = smov %s370_s10 }
  0xae   : > { %s450_s10 = smov %s417_s16  ;;  %s451_s11 = smov %s408_s13 }
  0xaf   :  { %11 = sbr.rel (!%p9_p9) target bundleno = 2 (0x2), region = 86 }

// kernel: spiking_conv2d_forward.3
= control target key start
LH: loop header
LB: loop body
LE: loop exit
PB: predicated region body
PF: predicated region fallthrough
CT: control target
= control target key end

     0   :  { %s915_s0 = inlined_call_operand.vmem [shape: f32[8,512], index: 0, kind: input, shape index: {}]   ;;  %s916_s1 = inlined_call_operand.vmem [shape: f32[8,8], index: 1, kind: input, shape index: {}]   ;;  %s917_s2 = inlined_call_operand.vmem [shape: f32[8,512], index: 2, kind: input, shape index: {}]   ;;  %s918_s3 = inlined_call_operand.<no memory space> [shape: f32[1], index: 3, kind: input, shape index: {}]   ;;  %s919_s4 = inlined_call_operand.vmem [shape: f32[8,8,512], index: 4, kind: output, shape index: {0}]   ;;  %s920_s5 = inlined_call_operand.vmem [shape: f32[8,8,512], index: 5, kind: output, shape index: {1}]   ;;  %s921_s6 = inlined_call_operand.hbm [shape: f32[1], index: 6, kind: output, shape index: {2}]   ;;  %s922_s7 = inlined_call_operand.hbm [shape: f32[1], index: 7, kind: output, shape index: {3}]  }
   0x1   :  { %13 = sst [smem:[#allocation7]] %s918_s3 }
   0x2   :  { %14 = vsyncpa [#allocation9], 0 }
   0x3   :  { %15 = vsyncpa [#allocation11], 0  ;;  %s836_s26 = smov 0  }
   0x4 LB: > { %s842_s27 = sadd.s32 4294967295, %s787_s26   ;;  %p691_p0 = scmp.ge.s32.totalorder %s787_s26, 1  ;;  %s787_s26 = sphi %s836_s26, %s21_s26  }
   0x5   : > { %p227_p1 = scmp.lt.s32.totalorder %s787_s26, 9 }
   0x7   : > { %p228_p2 = pnand %p691_p0, %p227_p1 }
   0x8   : > { %p259_p3 = scmp.lt.s32.totalorder (!%p228_p2), %s842_s27, 7  ;;  %s847_s3 = sld [smem:[#allocation7]] (!%p228_p2) }
   0x9   : > { %231 = sbr.rel (%p228_p2) target bundleno = 406 (0x196), region = 36  ;;  %p696_p4 = scmp.ne.s32.totalorder (!%p228_p2), %s842_s27, 0 }
   0xe   : > { %s260_s28 = scalar_select %p259_p3, %s842_s27, 7 }
   0xf   : > { %273 = sbr.rel (%p696_p4) target bundleno = 37 (0x25), region = 40 }
  0x10   : > { %s714_s29 = sshll.u32 %s260_s28, 5 }
  0x11   : > { %s853_s9 = scalar_lea.vmem %s919_s4, %s714_s29  ;;  %s858_s12 = scalar_lea.vmem %s920_s5, %s714_s29 }
  0x14   : > { %v789_v0 = vmov 0.0  }
  0x15   : > { %274 = vst [vmem:[#allocation2 + $0x10] sm:$0xff] %v789_v0 }
  0x16   : > { %275 = vst [vmem:[#allocation2] sm:$0xff] %v789_v0 }
  0x17   : > { %276 = vst [vmem:[#allocation2 + $0x18] sm:$0xff] %v789_v0 }
  0x18   : > { %277 = vst [vmem:[#allocation2 + $0x8] sm:$0xff] %v789_v0 }
  0x19   : > { %278 = vst [vmem:[#allocation3] sm:$0xff] %v789_v0 }
  0x1a   : > { %279 = vst [vmem:[#allocation3 + $0x18] sm:$0xff] %v789_v0 }
  0x1b   : > { %280 = vst [vmem:[#allocation3 + $0x8] sm:$0xff] %v789_v0 }
  0x1c   : > { %281 = vst [vmem:[#allocation3 + $0x10] sm:$0xff] %v789_v0 }
  0x1d   : > { %282 = vst [vmem:[#allocation4] sm:$0xff] %v789_v0 }
  0x1e   : > { %283 = vst [vmem:[#allocation4 + $0x8] sm:$0xff] %v789_v0 }
  0x1f   : > { %284 = vst [vmem:[#allocation4 + $0x10] sm:$0xff] %v789_v0 }
  0x20   : > { %285 = vst [vmem:[#allocation4 + $0x18] sm:$0xff] %v789_v0 }
  0x21   : > { %286 = vst [vmem:[#allocation5] sm:$0xff] %v789_v0 }
  0x22   : > { %287 = vst [vmem:[#allocation5 + $0x10] sm:$0xff] %v789_v0 }
  0x23   : > { %288 = vst [vmem:[#allocation5 + $0x18] sm:$0xff] %v789_v0 }
  0x24   : > { %289 = vst [vmem:[#allocation5 + $0x8] sm:$0xff] %v789_v0 }
  0x25 PF: > { %v295_v1 = vld [vmem:[#allocation3 + $0x18] sm:$0xff]  ;;  %v296_v2 = vld [vmem:[#allocation3 + $0x8] sm:$0xff]  ;;  %v297_v3 = vld [vmem:[#allocation3 + $0x10] sm:$0xff]  ;;  %vm303_vm0 = vcmask 64512   ;;  %v391_v8 = vstv %s847_s3  ;;  %v790_v28 = vmov 0.0   ;;  %s510_s10 = sshra.s32 %s842_s27, 3 }
  0x26   : > { %342 = vmatpush.msra.mxu1 %v295_v1  ;;  %362 = vmatpush.msra.mxu2 %v296_v2  ;;  %v302_v4 = vld [vmem:[%s916_s1] sm:$0xff]  ;;  %v290_v10 = vld [vmem:[#allocation2 + $0x10] sm:$0xff]  ;;  %v299_v11 = vld [vmem:[#allocation4 + $0x8] sm:$0xff]  ;;  %s513_s11 = sand.u32 7, %s842_s27  ;;  %s716_s13 = sshll.u32 %s510_s10, 5  ;;  %vm499_vm5 = vcmask 1040384  }
  0x27   : > { %v294_v5 = vld [vmem:[#allocation3] sm:$0xff]  ;;  %382 = vmatpush.msra.mxu3 %v297_v3  ;;  %698 = vmatmul.msk.f32.vlgmr.msra.gmra.mxu1 %vm303_vm0, %v302_v4  ;;  %v397_v12 = vld [vmem:[%s915_s0 + $0x8] sm:$0xff]  ;;  %v421_v19 = vsub.f32 3.0, %v299_v11  ;;  %v292_v21 = vld [vmem:[#allocation2 + $0x18] sm:$0xff]  ;;  %s516_s14 = sadd.s32 %s716_s13, %s513_s11  ;;  %vm501_vm6 = vcmask 1042434   ;;  %vm503_vm7 = vcmask 1041408  }
  0x28   : > { %699 = vmatmul.msk.f32.vlgmr.msra.gmra.mxu2 %vm303_vm0, %v302_v4  ;;  %700 = vmatmul.msk.f32.vlgmr.msra.gmra.mxu3 %vm303_vm0, %v302_v4  ;;  %v291_v6 = vld [vmem:[#allocation2] sm:$0xff]  ;;  %v405_v15 = vld [vmem:[%s917_s2 + $0x8] sm:$0xff]  ;;  %v300_v34 = vld [vmem:[#allocation4 + $0x10] sm:$0xff]  ;;  %s517_s15 = scalar_lea.vmem [#allocation6], %s516_s14  ;;  %p707_p5 = scmp.ne.s32.totalorder %s842_s27, 7 }
  0x29   : > { %322 = vmatpush.msra.mxu0 %v294_v5  ;;  %v298_v16 = vld [vmem:[#allocation4] sm:$0xff]  ;;  %v293_v22 = vld [vmem:[#allocation2 + $0x8] sm:$0xff]  ;;  %v398_v35 = vld [vmem:[%s915_s0 + $0x10] sm:$0xff]  ;;  %v422_v48 = vsub.f32 3.0, %v300_v34 }
  0x2a   : > { %697 = vmatmul.msk.f32.vlgmr.msra.gmra.mxu0 %vm303_vm0, %v302_v4  ;;  %v396_v20 = vld [vmem:[%s915_s0] sm:$0xff]  ;;  %v420_v25 = vsub.f32 3.0, %v298_v16  ;;  %v399_v36 = vld [vmem:[%s915_s0 + $0x18] sm:$0xff]  ;;  %v453_v37 = vld [vmem:[#allocation5 + $0x10] sm:$0xff] }
  0x2b   : > { %v404_v24 = vld [vmem:[%s917_s2] sm:$0xff]  ;;  %v301_v39 = vld [vmem:[#allocation4 + $0x18] sm:$0xff]  ;;  %v406_v45 = vld [vmem:[%s917_s2 + $0x10] sm:$0xff] }
  0x2c   : > { %v407_v50 = vld [vmem:[%s917_s2 + $0x18] sm:$0xff]  ;;  %v452_v53 = vld [vmem:[#allocation5] sm:$0xff]  ;;  %v423_v54 = vsub.f32 3.0, %v301_v39 }
  0x2d   : > { %v454_v4 = vld [vmem:[#allocation5 + $0x18] sm:$0xff] }
  0xa4   : > { %v344_v7 = vpop.f32.mrf.mxu1 }
  0xa5   : > { %v388_v9 = vsub.f32 %v291_v6, %v344_v7 }
  0xa7   : > { %v393_v13 = vmul.f32 %v391_v8, %v388_v9  ;;  %v324_v14 = vpop.f32.mrf.mxu0 }
  0xa8   : > { %v387_v17 = vsub.f32 %v290_v10, %v324_v14 }
  0xa9   : > { %v401_v18 = vadd.f32 %v397_v12, %v393_v13 }
  0xaa   : > { %v392_v23 = vmul.f32 %v391_v8, %v387_v17 }
  0xab   : > { %vm409_vm1 = vcmp.gt.f32.partialorder %v401_v18, %v405_v15  ;;  %429 = vst [vmem:[#allocation2] sm:$0xff] %v401_v18  ;;  %v364_v26 = vpop.f32.mrf.mxu2  ;;  %v384_v27 = vpop.f32.mrf.mxu3 }
  0xac   : > { %v702_v29 = vsel %vm409_vm1, 1.0, %v790_v28  ;;  %449 = vst [vmem:[%s858_s12 + $0x8] sm:$0xff] %v401_v18  ;;  %v400_v30 = vadd.f32 %v396_v20, %v392_v23  ;;  %v389_v31 = vsub.f32 %v292_v21, %v364_v26  ;;  %v390_v32 = vsub.f32 %v293_v22, %v384_v27  ;;  %v455_v18 = vld [vmem:[#allocation5 + $0x8] sm:$0xff] }
  0xad   : > { %v425_v33 = vmul.f32 %v702_v29, %v421_v19  ;;  %v506_v26 = vlaneseq }
  0xae   : > { %vm408_vm2 = vcmp.gt.f32.partialorder %v400_v30, %v404_v24  ;;  %428 = vst [vmem:[#allocation2 + $0x10] sm:$0xff] %v400_v30  ;;  %v394_v38 = vmul.f32 %v391_v8, %v389_v31  ;;  %v395_v40 = vmul.f32 %v391_v8, %v390_v32 }
  0xaf   : > { %433 = vst [vmem:[#allocation3 + $0x18] sm:$0xff] %v425_v33  ;;  %v437_v41 = vadd.f32 %v425_v33, %v299_v11  ;;  %v457_v42 = vmul.f32 %v425_v33, %v425_v33  ;;  %v474_v43 = vrot.slane %v425_v33, 4  ;;  %v701_v44 = vsel %vm408_vm2, 1.0, %v790_v28 }
  0xb0   : > { %445 = vst [vmem:[%s853_s9 + $0x8] sm:$0xff] %v425_v33  ;;  %v424_v46 = vmul.f32 %v701_v44, %v420_v25  ;;  %v402_v47 = vadd.f32 %v398_v35, %v394_v38  ;;  %v888_v49 = vadd.f32 %v399_v36, %v395_v40  ;;  %vm508_vm8 = vcmp.lt.s32.totalorder %v506_v26, 512 }
  0xb1   : > { %441 = vst [vmem:[#allocation4 + $0x8] sm:$0xff] %v437_v41  ;;  %v461_v51 = vadd.f32 %v457_v42, %v453_v37  ;;  %v475_v52 = vadd.f32 %v474_v43, %v425_v33 }
  0xb2   : > { %432 = vst [vmem:[#allocation3] sm:$0xff] %v424_v46  ;;  %v436_v55 = vadd.f32 %v424_v46, %v298_v16  ;;  %v456_v56 = vmul.f32 %v424_v46, %v424_v46  ;;  %v468_v57 = vrot.slane %v424_v46, 4  ;;  %vm410_vm3 = vcmp.gt.f32.partialorder %v402_v47, %v406_v45 }
  0xb3   : > { %465 = vst [vmem:[#allocation5 + $0x10] sm:$0xff] %v461_v51  ;;  %v476_v58 = vrot.slane %v475_v52, 2  ;;  %v703_v59 = vsel %vm410_vm3, 1.0, %v790_v28  ;;  %vm411_vm4 = vcmp.gt.f32.partialorder %v888_v49, %v407_v50 }
  0xb4   : > { %440 = vst [vmem:[#allocation4] sm:$0xff] %v436_v55  ;;  %v460_v60 = vadd.f32 %v456_v56, %v452_v53  ;;  %v469_v61 = vadd.f32 %v468_v57, %v424_v46  ;;  %v426_v62 = vmul.f32 %v703_v59, %v422_v48  ;;  %v704_v63 = vsel %vm411_vm4, 1.0, %v790_v28 }
  0xb5   : > { %v477_v0 = vadd.f32 %v476_v58, %v475_v52  ;;  %444 = vst [vmem:[%s853_s9] sm:$0xff] %v424_v46  ;;  %v427_v1 = vmul.f32 %v704_v63, %v423_v54 }
  0xb6   : > { %448 = vst [vmem:[%s858_s12] sm:$0xff] %v400_v30  ;;  %v470_v2 = vrot.slane %v469_v61, 2  ;;  %v438_v3 = vadd.f32 %v426_v62, %v300_v34  ;;  %v458_v5 = vmul.f32 %v426_v62, %v426_v62  ;;  %v480_v6 = vrot.slane %v426_v62, 4 }
  0xb7   : > { %464 = vst [vmem:[#allocation5] sm:$0xff] %v460_v60  ;;  %v486_v7 = vrot.slane %v427_v1, 4  ;;  %v478_v9 = vrot.slane %v477_v0, 1  ;;  %v459_v14 = vmul.f32 %v427_v1, %v427_v1  ;;  %v439_v17 = vadd.f32 %v427_v1, %v301_v39 }
  0xb8   : > { %430 = vst [vmem:[#allocation2 + $0x18] sm:$0xff] %v402_v47  ;;  %v481_v8 = vadd.f32 %v480_v6, %v426_v62  ;;  %v471_v10 = vadd.f32 %v470_v2, %v469_v61  ;;  %v462_v11 = vadd.f32 %v458_v5, %v454_v4 }
  0xb9   : > { %434 = vst [vmem:[#allocation3 + $0x8] sm:$0xff] %v426_v62  ;;  %v487_v12 = vadd.f32 %v486_v7, %v427_v1  ;;  %v479_v19 = vadd.f32 %v478_v9, %v477_v0  ;;  %v463_v23 = vadd.f32 %v459_v14, %v455_v18 }
  0xba   : > { %442 = vst [vmem:[#allocation4 + $0x10] sm:$0xff] %v438_v3  ;;  %v482_v13 = vrot.slane %v481_v8, 2  ;;  %v472_v20 = vrot.slane %v471_v10, 1 }
  0xbb   : > { %446 = vst [vmem:[%s853_s9 + $0x10] sm:$0xff] %v426_v62  ;;  %v488_v15 = vrot.slane %v487_v12, 2  ;;  %v496_v27 = vrot.slane %v479_v19, 7 }
  0xbc   : > { %450 = vst [vmem:[%s858_s12 + $0x10] sm:$0xff] %v402_v47  ;;  %v483_v16 = vadd.f32 %v482_v13, %v481_v8  ;;  %v473_v28 = vadd.f32 %v472_v20, %v471_v10 }
  0xbd   : > { %466 = vst [vmem:[#allocation5 + $0x18] sm:$0xff] %v462_v11  ;;  %v489_v21 = vadd.f32 %v488_v15, %v487_v12 }
  0xbe   : > { %v484_v22 = vrot.slane %v483_v16, 1  ;;  %431 = vst [vmem:[#allocation2 + $0x8] sm:$0xff] %v888_v49  ;;  %v500_v32 = vsel %vm499_vm5, %v473_v28, %v496_v27 }
  0xbf   : > { %435 = vst [vmem:[#allocation3 + $0x10] sm:$0xff] %v427_v1  ;;  %v490_v24 = vrot.slane %v489_v21, 1 }
  0xc0   : > { %v485_v25 = vadd.f32 %v484_v22, %v483_v16  ;;  %443 = vst [vmem:[#allocation4 + $0x18] sm:$0xff] %v439_v17 }
  0xc1   : > { %447 = vst [vmem:[%s853_s9 + $0x18] sm:$0xff] %v427_v1  ;;  %v491_v29 = vadd.f32 %v490_v24, %v489_v21 }
  0xc2   : > { %v497_v30 = vrot.slane %v485_v25, 6  ;;  %451 = vst [vmem:[%s858_s12 + $0x18] sm:$0xff] %v888_v49 }
  0xc3   : > { %467 = vst [vmem:[#allocation5 + $0x8] sm:$0xff] %v463_v23  ;;  %v498_v31 = vrot.slane %v491_v29, 5  ;;  %523 = sbr.rel (%p707_p5) target bundleno = 396 (0x18c), region = 44 }
  0xc5   : > { %v502_v33 = vsel %vm501_vm6, %v497_v30, %v498_v31 }
  0xc6   : > { %v504_v34 = vsel %vm503_vm7, %v500_v32, %v502_v33 }
  0xc7   : > { %518 = vst.msk [vmem:[%s517_s15] ss:$8 sm:$0xf] %vm508_vm8, %v504_v34 }
  0xc8   : > { %v524_v35 = vld [vmem:[#allocation5] sm:$0xff]  ;;  %v525_v36 = vld [vmem:[#allocation5 + $0x10] sm:$0xff]  ;;  %v526_v37 = vld [vmem:[#allocation5 + $0x18] sm:$0xff] }
  0xc9   : > { %v528_v38 = vadd.f32 %v525_v36, %v524_v35 }
  0xca   : > { %v527_v41 = vld [vmem:[#allocation5 + $0x8] sm:$0xff] }
  0xcb   : > { %v529_v42 = vadd.f32 %v528_v38, %v526_v37 }
  0xcd   : > { %v530_v45 = vadd.f32 %v529_v42, %v527_v41 }
  0xce   : > { %v543_v39 = vld [vmem:[#allocation6] sm:$0xff]  ;;  %v544_v40 = vld [vmem:[#allocation6 + $0x8] sm:$0xff]  ;;  %v545_v44 = vld [vmem:[#allocation6 + $0x10] sm:$0xff] }
  0xcf   : > { %v547_v43 = vadd.f32 %v544_v40, %v543_v39  ;;  %531 = vadd.xlane.f32.xlu0 %v530_v45  ;;  %v546_v47 = vld [vmem:[#allocation6 + $0x18] sm:$0xff] }
  0xd1   : > { %v548_v46 = vadd.f32 %v547_v43, %v545_v44 }
  0xd3   : > { %v549_v48 = vadd.f32 %v548_v46, %v546_v47 }
  0xd7   : > { %550 = vadd.xlane.f32.xlu0 %v549_v48 }
 0x142   : > { %v532_v49 = vpop.xlane.xlu0 %531 }
 0x143   : > { %v533_v50 = vrot.slane %v532_v49, 4 }
 0x145   : > { %v534_v51 = vadd.f32 %v533_v50, %v532_v49 }
 0x147   : > { %v535_v52 = vrot.slane %v534_v51, 2 }
 0x149   : > { %v536_v53 = vadd.f32 %v535_v52, %v534_v51 }
 0x14a   : > { %v551_v54 = vpop.xlane.xlu0 %550 }
 0x14b   : > { %v552_v55 = vrot.slane %v551_v54, 4  ;;  %v537_v56 = vrot.slane %v536_v53, 1 }
 0x14d   : > { %v553_v57 = vmax.f32 %v551_v54, %v552_v55  ;;  %v538_v58 = vadd.f32 %v537_v56, %v536_v53 }
 0x14f   : > { %v554_v59 = vrot.slane %v553_v57, 2  ;;  %717 = vpush %v538_v58 }
 0x151   : > { %v555_v60 = vmax.f32 %v553_v57, %v554_v59 }
 0x153   : > { %v556_v61 = vrot.slane %v555_v60, 1 }
 0x155   : > { %v557_v62 = vmax.f32 %v555_v60, %v556_v61 }
 0x157   : > { %719 = vpush %v557_v62 }
 0x180   : > { %s718_s9 = spop %717 }
 0x181   : > { %s540_s12 = smul.f32 1.5258789e-05, %s718_s9 }
 0x183   : > { %542 = sst [smem:[#allocation8]] %s540_s12 }
 0x188   : > { %s720_s16 = spop %719 }
 0x189   : > { %s559_s17 = smul.f32 0.00024414063, %s720_s16 }
 0x18b   : > { %561 = sst [smem:[#allocation10]] %s559_s17 }
 0x18c PF: > { %p729_p6 = scmp.eq.s32.totalorder %s842_s27, 7  ;;  %s584_s20 = sshll.u32 %s921_s6, 4  ;;  %s585_s20 = int_to_ptr.hbm [resolvable:$true] %s584_s20 }
 0x18d   : > { %s791_s21 = smov [#allocation8]   ;;  %s594_s24 = sshll.u32 %s922_s7, 4  ;;  %s595_s24 = int_to_ptr.hbm [resolvable:$true] %s594_s24 }
 0x18e   : > { %722 = dma.smem_to_hbm (%p729_p6), %s791_s21, 16, %s585_s20, [#allocation9]  }
 0x18f   : > { %s792_s25 = smov [#allocation10]  }
 0x190   : > { %724 = dma.smem_to_hbm (%p729_p6), %s792_s25, 16, %s595_s24, [#allocation11]  }
 0x191   : > { %778 = dma.done.wait (%p729_p6), [#allocation9], 16  }
 0x192   : > { %780 = vsyncadd (%p729_p6), [#allocation9], 4294967280 }
 0x193   : > { %782 = dma.done.wait (%p729_p6), [#allocation11], 16  }
 0x194   : > { %784 = vsyncadd (%p729_p6), [#allocation11], 4294967280 }
 0x195   : > { %608 = sfence }
 0x196 PF: > { %s21_s26 = sadd.s32 1, %s787_s26  }
 0x197   : > { %p18_p7 = scmp.ge.s32.totalorder %s21_s26, 10  }
 0x199   :  { %20 = sbr.rel (!%p18_p7) target bundleno = 4 (0x4), region = 103 }
 0x19e   :  { %630 = vsyncpa [#allocation9], 1 }
 0x19f   :  { %632 = vsyncpa [#allocation9 + $0x1], 1 }
 0x1a0   :  { %633 = vsyncpa [#allocation11], 1 }

</bundles_post_ra>
